<compile_context>
chip_gen: v6e
topology: v6e:2x2x1
jax: 0.10.0
libtpu: 0.0.40
codegen_flags: <defaults>
</compile_context>

<pallas_src>
import functools

import numpy as np
import jax
import jax.numpy as jnp
from jax.experimental import pallas as pl
from jax.experimental.pallas import tpu as pltpu


def _make_ema_kernel(momentum: float):
    """Build the EMA kernel with momentum baked in as compile-time literals."""
    # Plain Python floats -> scalar literals in the jaxpr (no captured
    # jax-array constants, which Pallas rejects).
    m = float(momentum)
    one_minus_m = 1.0 - m

    def _ema_update_kernel(kw_ref, new_ref, out_ref):
        # out = m * kernel_width + (1 - m) * new   (single scalar FMA in SMEM)
        out_ref[0] = m * kw_ref[0] + one_minus_m * new_ref[0]

    return _ema_update_kernel


@functools.lru_cache(maxsize=None)
def _build_ema_update(momentum: float):
    """Jitted, donation-enabled wrapper around the Pallas EMA update."""
    smem_spec = pl.BlockSpec(memory_space=pltpu.SMEM)
    call = pl.pallas_call(
        _make_ema_kernel(momentum),
        out_shape=jax.ShapeDtypeStruct((1,), jnp.float32),
        in_specs=[smem_spec, smem_spec],
        out_specs=smem_spec,
        input_output_aliases={0: 0},  # update kernel_width in place
    )

    def _update(kw, new):
        # Reshapes are inside the jit -> free (layout no-ops for a scalar).
        kw1 = jnp.reshape(kw.astype(jnp.float32), (1,))
        new1 = jnp.reshape(jnp.asarray(new, dtype=jnp.float32), (1,))
        out = call(kw1, new1)
        return jnp.reshape(out, ())  # canonical state stays 0-d

    # Donating arg 0 lets XLA reuse the state buffer in place on TPU.
    donate = (0,) if jax.default_backend() == "tpu" else ()
    return jax.jit(_update, donate_argnums=donate)


class Cfg:
    def __init__(self, initial_value=None, momentum=0.9):
        self.initial_value = initial_value
        self.momentum = momentum


class _KernelWidth:
    """JAX mirror of the PyTorch `_KernelWidth` base class."""

    def __init__(self, cfg, input_size):
        self.cfg = cfg
        self.input_size = input_size
        # Faithful to `cfg.initial_value or np.nan` (falsy -> NaN), matching
        # the PyTorch source (a legitimate 0.0 init becomes NaN there too).
        initial_value = cfg.initial_value or np.nan
        # Scalar state kept device-resident as a 0-d f32 array (same shape the
        # PyTorch buffer has), so forward() never dispatches a reshape.
        self.kernel_width = jnp.asarray(initial_value, dtype=jnp.float32)
        self._ema_update = _build_ema_update(float(cfg.momentum))

    def forward(self, inputs=None, distances=None, assignments=None):
        raise NotImplementedError(
            "_KernelWidth.forward is abstract; subclasses define it."
        )

    def update_buffer(self, new):
        # In-place (aliased + donated-on-TPU) scalar EMA update on device.
        # NOTE: the previous self.kernel_width array is invalidated when
        # donation applies; always read the state via this attribute/forward.
        self.kernel_width = self._ema_update(self.kernel_width, new)
        return self.kernel_width


class Constant(_KernelWidth):
    """`Constant` kernel width: forward returns the (possibly EMA-updated) buffer."""

    def __init__(self, cfg, input_size):
        super().__init__(cfg, input_size)

    def forward(self, inputs=None, distances=None, assignments=None):
        # Matches the PyTorch 0-d buffer return; no compute -> no dispatch.
        return self.kernel_width


if __name__ == "__main__":
    key = jax.random.PRNGKey(0)

    # Deterministic example `new` kernel-width value (as would be produced
    # elsewhere from pairwise distances; glue, not part of this module).
    new_val = jnp.abs(jax.random.normal(key, (), dtype=jnp.float32)) + 0.5

    cfg = Cfg(initial_value=1.0, momentum=0.9)
    module = Constant(cfg, input_size=32)

    # Forward pass before any update: returns the initial buffer value.
    kw0 = jax.block_until_ready(module.forward())
    assert np.allclose(np.asarray(kw0), 1.0), np.asarray(kw0)

    # First EMA update (exercises the Pallas kernel).
    module.update_buffer(new_val)
    updated = jax.block_until_ready(module.forward())

    expected = np.float32(cfg.momentum) * np.float32(1.0) + (
        np.float32(1.0) - np.float32(cfg.momentum)
    ) * np.asarray(new_val, dtype=np.float32)
    assert np.allclose(np.asarray(updated), expected, rtol=1e-6, atol=1e-6), (
        np.asarray(updated),
        expected,
    )

    # Second update exercises the aliased / in-place path again.
    new_val2 = jnp.float32(2.0)
    module.update_buffer(new_val2)
    updated2 = jax.block_until_ready(module.forward())
    expected2 = np.float32(cfg.momentum) * expected + np.float32(
        1.0 - cfg.momentum
    ) * np.float32(2.0)
    assert np.allclose(np.asarray(updated2), expected2, rtol=1e-6, atol=1e-6), (
        np.asarray(updated2),
        expected2,
    )

    print("KERNEL_OK")
</pallas_src>

<mosaic_0001>
module attributes {stable_mosaic.version = 11 : i64} {
  func.func @_ema_update_kernel(%arg0: memref<1xf32, #tpu.memory_space<smem>>, %arg1: memref<1xf32, #tpu.memory_space<smem>>, %arg2: memref<1xf32, #tpu.memory_space<smem>>) attributes {dimension_semantics = [], scalar_prefetch = 0 : i64, scratch_operands = 0 : i64, tpu.core_type = #tpu.core_type<tc>} {
    %c0 = arith.constant 0 : index
    %0 = memref.load %arg0[%c0] : memref<1xf32, #tpu.memory_space<smem>>
    %cst = arith.constant 0.899999976 : f32
    %1 = arith.mulf %cst, %0 : f32
    %c0_0 = arith.constant 0 : index
    %2 = memref.load %arg1[%c0_0] : memref<1xf32, #tpu.memory_space<smem>>
    %cst_1 = arith.constant 1.000000e-01 : f32
    %3 = arith.mulf %cst_1, %2 : f32
    %4 = arith.addf %1, %3 : f32
    %c0_2 = arith.constant 0 : index
    %5 = memref.load %arg2[%c0_2] : memref<1xf32, #tpu.memory_space<smem>>
    memref.store %4, %arg2[%c0_2] : memref<1xf32, #tpu.memory_space<smem>>
    return
  }
}

</mosaic_0001>

<bundles_post_ra>
// kernel: _update.1
= control target key start
LH: loop header
LB: loop body
LE: loop exit
PB: predicated region body
PF: predicated region fallthrough
CT: control target
= control target key end

     0   :  { %9 = vsyncpa [#allocation5], 0  ;;  %s45_s16 = smov [#allocation4]   ;;  %s70_s0 = inlined_call_operand.<no memory space> [shape: f32[1], index: 0, kind: input, shape index: {}, may-alias: {0,2}]   ;;  %s71_s1 = inlined_call_operand.<no memory space> [shape: f32[1], index: 1, kind: input, shape index: {}]   ;;  %s72_s2 = inlined_call_operand.hbm [shape: f32[1], index: 2, kind: output, shape index: {}, may-alias: {0,2}]  }
   0x1   :  { %s15_s11 = smul.f32 0.9, %s70_s0 }
   0x2   :  { %s17_s14 = smul.f32 0.1, %s71_s1 }
   0x4   :  { %s18_s15 = sadd.f32 %s17_s14, %s15_s11 }
   0x6   :  { %20 = sst [smem:[#allocation4]] %s18_s15 }
   0x7   :  { %28 = dma.smem_to_hbm %s45_s16, 16, %s72_s2, [#allocation5]  }
   0x8   :  { %43 = dma.done.wait [#allocation5], 16  }
   0x9   :  { %44 = vsyncadd [#allocation5], 4294967280 }
   0xa   :  { %32 = sfence }
   0xb   :  { %33 = vsyncpa [#allocation5], 1 }

</bundles_post_ra>
